<compile_context>
chip_gen: v7x
topology: tpu7x:2x2x1
jax: 0.10.0
libtpu: 0.0.40
codegen_flags: <defaults>
</compile_context>

<pallas_src>
import functools

import jax
import jax.numpy as jnp
from jax import lax
from jax.experimental import pallas as pl
from jax.experimental.pallas import tpu as pltpu


def _vq_kernel(z_ref, cb_ref, csq_ref, zq_ref, aux_ref, *,
               num_top_k, idx_bits, exact_topk):
    K = num_top_k
    z = z_ref[...].astype(jnp.float32)          # [bt, Dp] f32 (native in HBM)
    bt = z.shape[0]
    cb = cb_ref[...]                            # [Np, Dp] bf16, resident
    Np = cb.shape[0]

    # cross2 = 2 * z @ cb^T on the MXU.  The factor 2 is folded into the bf16
    # operand (exact exponent bump) -> no [bt, Np] VPU multiply afterwards.
    cross2 = lax.dot_general(
        (2.0 * z).astype(jnp.bfloat16), cb,
        dimension_numbers=(((1,), (1,)), ((), ())),
        preferred_element_type=jnp.float32)     # [bt, Np] f32

    # Distance without the per-row ||z||^2 term (argmin / softmax invariant).
    d_rel = csq_ref[...] - cross2               # [bt, Np]
    iota_n = lax.broadcasted_iota(jnp.int32, (bt, Np), 1)

    idx_cols = []     # K x [bt, 1] int32, ascending distance
    dist_cols = []    # K x [bt, 1] f32 (share a per-row constant offset)
    if exact_topk:
        # Full-precision selection: 2 reduces + 2 selects per step.
        d_cur = d_rel
        for i in range(K):
            m_val = jnp.min(d_cur, axis=1, keepdims=True)
            m_idx = jnp.min(jnp.where(d_cur == m_val, iota_n, Np),
                            axis=1, keepdims=True)
            idx_cols.append(m_idx)
            dist_cols.append(m_val)
            if i + 1 < K:
                d_cur = jnp.where(iota_n == m_idx, jnp.float32(jnp.inf), d_cur)
    else:
        # Packed-key selection: the ||z||^2 offset + relu make the distance
        # non-negative, so its f32 bit pattern is order-preserving as int32;
        # the low `idx_bits` mantissa bits carry the codebook index (ties
        # break toward the lowest index).  Each step = 1 reduce + 1 select.
        z_sq = jnp.sum(z * z, axis=1, keepdims=True)            # [bt, 1]
        d_abs = jnp.maximum(z_sq + d_rel, 0.0)                   # ||z - c||^2
        lo_mask = jnp.int32((1 << idx_bits) - 1)
        hi_mask = jnp.int32(~((1 << idx_bits) - 1))
        key = (pltpu.bitcast(d_abs, jnp.int32) & hi_mask) | iota_n
        poison = jnp.int32(jnp.iinfo(jnp.int32).max)
        for i in range(K):
            m_key = jnp.min(key, axis=1, keepdims=True)          # [bt, 1]
            idx_cols.append(m_key & lo_mask)
            dist_cols.append(pltpu.bitcast(m_key & hi_mask, jnp.float32))
            if i + 1 < K:
                # keys are unique per row -> exactly one lane poisoned
                key = jnp.where(key == m_key, poison, key)

    # Softmax over the K ascending distances (exp / reciprocal on the EUP).
    e_cols = [jnp.exp(dist_cols[0] - dist_cols[i]) for i in range(K)]
    denom = e_cols[0]
    for t in e_cols[1:]:
        denom = denom + t
    inv_denom = pl.reciprocal(denom, approx=True)
    w_cols = [e * inv_denom for e in e_cols]                     # K x [bt, 1]

    # Weighted selection matrix rebuilt as ONE fused expression (f32 accum,
    # single bf16 cast right at the MXU dot).
    W = jnp.where(iota_n == idx_cols[0], w_cols[0], 0.0)
    for i in range(1, K):
        W = W + jnp.where(iota_n == idx_cols[i], w_cols[i], 0.0)

    z_q = lax.dot_general(
        W.astype(jnp.bfloat16), cb,
        dimension_numbers=(((1,), (0,)), ((), ())),
        preferred_element_type=jnp.float32)                      # [bt, Dp] f32

    zq_ref[...] = z_q.astype(zq_ref.dtype)

    # Lane-dense aux slab: lanes 0..K-1 = top-K indices, lane K = per-row
    # sum((z_q - z)^2) bitcast to int32, remaining lanes zero.
    diff = z_q - z
    ssq_bits = pltpu.bitcast(jnp.sum(diff * diff, axis=1, keepdims=True),
                             jnp.int32)                          # [bt, 1]
    lane = lax.broadcasted_iota(jnp.int32, (bt, 128), 1)
    aux = jnp.where(lane == K, ssq_bits, 0)
    for i in range(K):
        aux = aux + jnp.where(lane == i, idx_cols[i], 0)
    aux_ref[...] = aux


def _round_up(x, m):
    return ((x + m - 1) // m) * m


def vector_quantize(z, codebook, *, num_top_k, alpha, block_b=256,
                    vmem_limit_bytes=40 * 1024 * 1024,
                    single_buffer_codebook=True, exact_topk=None):
    """Pallas forward pass of VectorQuantizer.

    Args:
      z:        [B, D] input vectors (any float dtype; kept native end-to-end).
      codebook: [N, D] codebook.
    Returns:
      z_q:           [B, D] quantized vectors (straight-through forward value).
      token_indices: [B, K] int32 indices of selected codebook entries.
      q_loss:        scalar float32 quantization loss (forward value).
    """
    B, D = z.shape
    N, D2 = codebook.shape
    assert D == D2, "embedding_dim mismatch"
    K = num_top_k
    assert 1 <= K <= N
    assert K < 128, "aux slab packs K indices + the loss partial into 128 lanes"

    Dp = _round_up(D, 128)
    Np = _round_up(N, 128)
    idx_bits = max(1, (Np - 1).bit_length())
    if exact_topk is None:
        # The packed key truncates the low `idx_bits` mantissa bits of the
        # distance; for very large codebooks prefer the exact selection path.
        exact_topk = idx_bits > 12

    # Batch tile: multiple of 8 sublanes, shrunk until resident codebook +
    # pipelined tiles + in-kernel [bt, Np] temporaries fit the VMEM budget.
    bt = max(8, min(block_b, _round_up(B, 8)))
    bt = _round_up(bt, 8)
    z_bytes = jnp.dtype(z.dtype).itemsize

    def vmem_estimate(bt_):
        tiles = 2 * bt_ * Dp * z_bytes * 2 + 2 * bt_ * 128 * 4      # z, z_q, aux
        resident = (1 if single_buffer_codebook else 2) * Np * Dp * 2 + 2 * Np * 4
        temps = 6 * bt_ * Np * 4 + 3 * bt_ * Dp * 4
        return tiles + resident + temps

    while bt > 8 and vmem_estimate(bt) > 0.75 * vmem_limit_bytes:
        bt = _round_up(bt // 2, 8)

    Bp = _round_up(B, bt)
    G = Bp // bt

    # Padding: zero D-columns are inert; padded codebook rows get ||c||^2 =
    # 1e30 so they are never selected (K <= N); padded batch rows are sliced
    # off before any reduction in the wrapper.
    z_p = jnp.pad(z, ((0, Bp - B), (0, Dp - D)))
    cb_f = jnp.pad(codebook.astype(jnp.float32), ((0, Np - N), (0, Dp - D)))
    csq = jnp.sum(cb_f * cb_f, axis=1)
    csq = jnp.where(jnp.arange(Np) < N, csq, jnp.float32(1e30))[None, :]
    cb_bf = cb_f.astype(jnp.bfloat16)            # cast once; MXU bf16 operand

    kernel = functools.partial(_vq_kernel, num_top_k=K, idx_bits=idx_bits,
                               exact_topk=exact_topk)

    def run(use_single_buffer):
        resident_kwargs = (
            dict(pipeline_mode=pl.Buffered(1)) if use_single_buffer else {})
        return pl.pallas_call(
            kernel,
            grid=(G,),
            in_specs=[
                pl.BlockSpec((bt, Dp), lambda i: (i, 0)),                    # z tile
                pl.BlockSpec((Np, Dp), lambda i: (0, 0), **resident_kwargs),  # codebook
                pl.BlockSpec((1, Np), lambda i: (0, 0), **resident_kwargs),   # ||c||^2
            ],
            out_specs=(
                pl.BlockSpec((bt, Dp), lambda i: (i, 0)),    # z_q tile  (lane-dense)
                pl.BlockSpec((bt, 128), lambda i: (i, 0)),   # aux slab  (lane-dense)
            ),
            out_shape=(
                jax.ShapeDtypeStruct((Bp, Dp), z.dtype),
                jax.ShapeDtypeStruct((Bp, 128), jnp.int32),
            ),
            compiler_params=pltpu.CompilerParams(
                # TODO(synk): on v7x, consider CORE_PARALLEL for explicit 2-TC sharding.
                dimension_semantics=("parallel",),
                vmem_limit_bytes=vmem_limit_bytes,
            ),
        )(z_p, cb_bf, csq)

    if single_buffer_codebook:
        try:
            z_q_p, aux = run(True)
        except Exception:  # pl.Buffered(1) unsupported on this JAX build -> default buffering
            z_q_p, aux = run(False)
    else:
        z_q_p, aux = run(False)

    z_q = z_q_p[:B, :D]
    token_indices = aux[:B, :K]
    row_ssq = lax.bitcast_convert_type(aux[:B, K], jnp.float32)
    # Forward value of mse(z_q.detach(), z) + alpha * mse(z_q, z.detach()).
    q_loss = (1.0 + alpha) * jnp.sum(row_ssq) / (B * D)
    return z_q, token_indices, q_loss


def _reference(z, codebook, num_top_k, alpha, idx_bits, exact_topk):
    """Pure-JAX reference mirroring the kernel's selection numerics."""
    N = codebook.shape[0]
    cross2 = lax.dot_general(
        (2.0 * z).astype(jnp.bfloat16), codebook.astype(jnp.bfloat16),
        dimension_numbers=(((1,), (1,)), ((), ())),
        preferred_element_type=jnp.float32)
    c_sq = jnp.sum(codebook.astype(jnp.float32) ** 2, axis=1)[None, :]
    z_sq = jnp.sum(z.astype(jnp.float32) ** 2, axis=1, keepdims=True)
    d = z_sq + c_sq - cross2                         # exact squared distance
    if exact_topk:
        _, idx = lax.top_k(-d, num_top_k)
    else:
        key = ((lax.bitcast_convert_type(jnp.maximum(d, 0.0), jnp.int32)
                & jnp.int32(~((1 << idx_bits) - 1)))
               | jnp.arange(N, dtype=jnp.int32)[None, :])
        idx = jnp.argsort(key, axis=1)[:, :num_top_k]
    d_k = jnp.take_along_axis(d, idx, axis=1)
    w = jax.nn.softmax(-d_k, axis=1)
    z_q = jnp.einsum("bk,bkd->bd", w, codebook[idx].astype(jnp.float32))
    loss = (1.0 + alpha) * jnp.mean((z_q - z.astype(jnp.float32)) ** 2)
    return z_q, idx, loss, d


if __name__ == "__main__":
    # Config implied by the module: embedding_dim, codebook_size, num_top_k, alpha.
    B, D, N, K = 8, 32, 64, 4
    ALPHA = 0.25

    key = jax.random.PRNGKey(0)
    k_z, k_cb = jax.random.split(key)
    z = jax.random.normal(k_z, (B, D), dtype=jnp.float32)
    # nn.Embedding weight init: uniform(-1/num_embeddings, 1/num_embeddings)
    codebook = jax.random.uniform(k_cb, (N, D), dtype=jnp.float32,
                                  minval=-1.0 / N, maxval=1.0 / N)

    z_q, token_indices, q_loss = jax.block_until_ready(
        vector_quantize(z, codebook, num_top_k=K, alpha=ALPHA))

    idx_bits = max(1, (_round_up(N, 128) - 1).bit_length())
    z_q_ref, idx_ref, loss_ref, d_ref = _reference(
        z, codebook, K, ALPHA, idx_bits, exact_topk=False)

    assert z_q.shape == (B, D) and z_q.dtype == z.dtype
    assert token_indices.shape == (B, K) and token_indices.dtype == jnp.int32
    if not jnp.array_equal(token_indices, idx_ref):
        # Benign near-tie reordering (distances equal within the packed-key
        # truncation / MXU rounding) is acceptable; anything else is a bug.
        d_sel_kernel = jnp.take_along_axis(d_ref, token_indices, axis=1)
        d_sel_ref = jnp.take_along_axis(d_ref, idx_ref, axis=1)
        assert jnp.allclose(d_sel_kernel, d_sel_ref, rtol=1e-3, atol=1e-3), \
            "index mismatch"
    assert jnp.allclose(z_q, z_q_ref, atol=2e-3), "z_q mismatch"
    assert jnp.allclose(q_loss, loss_ref, rtol=1e-3, atol=1e-3), "loss mismatch"

    print("KERNEL_OK")
</pallas_src>

<mosaic_0001>
module attributes {stable_mosaic.version = 11 : i64} {
  func.func @_vq_kernel(%arg0: i32, %arg1: memref<8x128xf32, #tpu.memory_space<vmem>>, %arg2: memref<128x128xbf16, #tpu.memory_space<vmem>>, %arg3: memref<1x128xf32, #tpu.memory_space<vmem>>, %arg4: memref<8x128xf32, #tpu.memory_space<vmem>>, %arg5: memref<8x128xi32, #tpu.memory_space<vmem>>) attributes {dimension_semantics = [#tpu.dimension_semantics<parallel>], iteration_bounds = array<i64: 1>, scalar_prefetch = 0 : i64, scratch_operands = 0 : i64, tpu.core_type = #tpu.core_type<tc>, window_params = [{transform_indices = @transform_0, window_bounds = array<i64: 8, 128>}, {pipeline_mode = #tpu.pipeline_mode<synchronous>, transform_indices = @transform_1, window_bounds = array<i64: 128, 128>}, {pipeline_mode = #tpu.pipeline_mode<synchronous>, transform_indices = @transform_2, window_bounds = array<i64: 1, 128>}, {transform_indices = @transform_3, window_bounds = array<i64: 8, 128>}, {transform_indices = @transform_4, window_bounds = array<i64: 8, 128>}]} {
    %c0 = arith.constant 0 : index
    %c0_0 = arith.constant 0 : index
    %0 = vector.load %arg1[%c0, %c0_0] : memref<8x128xf32, #tpu.memory_space<vmem>>, vector<8x128xf32>
    %c0_1 = arith.constant 0 : index
    %c0_2 = arith.constant 0 : index
    %1 = vector.load %arg2[%c0_1, %c0_2] : memref<128x128xbf16, #tpu.memory_space<vmem>>, vector<128x128xbf16>
    %cst = arith.constant 2.000000e+00 : f32
    %2 = vector.broadcast %cst : f32 to vector<8x128xf32>
    %3 = arith.mulf %2, %0 : vector<8x128xf32>
    %4 = arith.truncf %3 : vector<8x128xf32> to vector<8x128xbf16>
    %cst_3 = arith.constant dense<0.000000e+00> : vector<8x128xf32>
    %5 = tpu.matmul %4, %1, %cst_3 {dimension_numbers = #tpu.dot_dimension_numbers<[1], [1], [0], [0], [0, 0, 1, 0], [], []>} : vector<8x128xbf16>, vector<128x128xbf16>, vector<8x128xf32> -> vector<8x128xf32>
    %c0_4 = arith.constant 0 : index
    %c0_5 = arith.constant 0 : index
    %6 = vector.load %arg3[%c0_4, %c0_5] : memref<1x128xf32, #tpu.memory_space<vmem>>, vector<1x128xf32>
    %7 = vector.broadcast %6 : vector<1x128xf32> to vector<8x128xf32>
    %8 = arith.subf %7, %5 : vector<8x128xf32>
    %9 = tpu.iota {dimensions = array<i32: 1>} : vector<8x128xi32>
    %10 = arith.mulf %0, %0 : vector<8x128xf32>
    %cst_6 = arith.constant dense<0.000000e+00> : vector<8xf32>
    %11 = vector.multi_reduction <add>, %10, %cst_6 [1] : vector<8x128xf32> to vector<8xf32>
    %12 = vector.shape_cast %11 : vector<8xf32> to vector<8x1xf32>
    %13 = vector.broadcast %12 : vector<8x1xf32> to vector<8x128xf32>
    %14 = arith.addf %13, %8 : vector<8x128xf32>
    %cst_7 = arith.constant 0.000000e+00 : f32
    %15 = vector.broadcast %cst_7 : f32 to vector<8x128xf32>
    %16 = arith.maximumf %14, %15 : vector<8x128xf32>
    %17 = tpu.bitcast %16 : vector<8x128xf32> -> vector<8x128xi32>
    %c-128_i32 = arith.constant -128 : i32
    %18 = vector.broadcast %c-128_i32 : i32 to vector<8x128xi32>
    %19 = arith.andi %17, %18 : vector<8x128xi32>
    %20 = arith.ori %19, %9 : vector<8x128xi32>
    %cst_8 = arith.constant dense<2147483647> : vector<8xi32>
    %21 = vector.multi_reduction <minsi>, %20, %cst_8 [1] : vector<8x128xi32> to vector<8xi32>
    %22 = vector.shape_cast %21 : vector<8xi32> to vector<8x1xi32>
    %c127_i32 = arith.constant 127 : i32
    %23 = vector.broadcast %c127_i32 : i32 to vector<8x1xi32>
    %24 = arith.andi %22, %23 : vector<8x1xi32>
    %c-128_i32_9 = arith.constant -128 : i32
    %25 = vector.broadcast %c-128_i32_9 : i32 to vector<8x1xi32>
    %26 = arith.andi %22, %25 : vector<8x1xi32>
    %27 = tpu.bitcast %26 : vector<8x1xi32> -> vector<8x1xf32>
    %28 = vector.broadcast %22 : vector<8x1xi32> to vector<8x128xi32>
    %29 = arith.cmpi eq, %20, %28 : vector<8x128xi32>
    %c2147483647_i32 = arith.constant 2147483647 : i32
    %30 = vector.broadcast %c2147483647_i32 : i32 to vector<8x128xi32>
    %31 = arith.select %29, %30, %20 : vector<8x128xi1>, vector<8x128xi32>
    %cst_10 = arith.constant dense<2147483647> : vector<8xi32>
    %32 = vector.multi_reduction <minsi>, %31, %cst_10 [1] : vector<8x128xi32> to vector<8xi32>
    %33 = vector.shape_cast %32 : vector<8xi32> to vector<8x1xi32>
    %c127_i32_11 = arith.constant 127 : i32
    %34 = vector.broadcast %c127_i32_11 : i32 to vector<8x1xi32>
    %35 = arith.andi %33, %34 : vector<8x1xi32>
    %c-128_i32_12 = arith.constant -128 : i32
    %36 = vector.broadcast %c-128_i32_12 : i32 to vector<8x1xi32>
    %37 = arith.andi %33, %36 : vector<8x1xi32>
    %38 = tpu.bitcast %37 : vector<8x1xi32> -> vector<8x1xf32>
    %39 = vector.broadcast %33 : vector<8x1xi32> to vector<8x128xi32>
    %40 = arith.cmpi eq, %31, %39 : vector<8x128xi32>
    %c2147483647_i32_13 = arith.constant 2147483647 : i32
    %41 = vector.broadcast %c2147483647_i32_13 : i32 to vector<8x128xi32>
    %42 = arith.select %40, %41, %31 : vector<8x128xi1>, vector<8x128xi32>
    %cst_14 = arith.constant dense<2147483647> : vector<8xi32>
    %43 = vector.multi_reduction <minsi>, %42, %cst_14 [1] : vector<8x128xi32> to vector<8xi32>
    %44 = vector.shape_cast %43 : vector<8xi32> to vector<8x1xi32>
    %c127_i32_15 = arith.constant 127 : i32
    %45 = vector.broadcast %c127_i32_15 : i32 to vector<8x1xi32>
    %46 = arith.andi %44, %45 : vector<8x1xi32>
    %c-128_i32_16 = arith.constant -128 : i32
    %47 = vector.broadcast %c-128_i32_16 : i32 to vector<8x1xi32>
    %48 = arith.andi %44, %47 : vector<8x1xi32>
    %49 = tpu.bitcast %48 : vector<8x1xi32> -> vector<8x1xf32>
    %50 = vector.broadcast %44 : vector<8x1xi32> to vector<8x128xi32>
    %51 = arith.cmpi eq, %42, %50 : vector<8x128xi32>
    %c2147483647_i32_17 = arith.constant 2147483647 : i32
    %52 = vector.broadcast %c2147483647_i32_17 : i32 to vector<8x128xi32>
    %53 = arith.select %51, %52, %42 : vector<8x128xi1>, vector<8x128xi32>
    %cst_18 = arith.constant dense<2147483647> : vector<8xi32>
    %54 = vector.multi_reduction <minsi>, %53, %cst_18 [1] : vector<8x128xi32> to vector<8xi32>
    %55 = vector.shape_cast %54 : vector<8xi32> to vector<8x1xi32>
    %c127_i32_19 = arith.constant 127 : i32
    %56 = vector.broadcast %c127_i32_19 : i32 to vector<8x1xi32>
    %57 = arith.andi %55, %56 : vector<8x1xi32>
    %c-128_i32_20 = arith.constant -128 : i32
    %58 = vector.broadcast %c-128_i32_20 : i32 to vector<8x1xi32>
    %59 = arith.andi %55, %58 : vector<8x1xi32>
    %60 = tpu.bitcast %59 : vector<8x1xi32> -> vector<8x1xf32>
    %61 = arith.subf %27, %27 : vector<8x1xf32>
    %62 = math.exp %61 : vector<8x1xf32>
    %63 = arith.subf %27, %38 : vector<8x1xf32>
    %64 = math.exp %63 : vector<8x1xf32>
    %65 = arith.subf %27, %49 : vector<8x1xf32>
    %66 = math.exp %65 : vector<8x1xf32>
    %67 = arith.subf %27, %60 : vector<8x1xf32>
    %68 = math.exp %67 : vector<8x1xf32>
    %69 = arith.addf %62, %64 : vector<8x1xf32>
    %70 = arith.addf %69, %66 : vector<8x1xf32>
    %71 = arith.addf %70, %68 : vector<8x1xf32>
    %72 = tpu.reciprocal %71 {approx = true} : vector<8x1xf32> -> vector<8x1xf32>
    %73 = arith.mulf %62, %72 : vector<8x1xf32>
    %74 = arith.mulf %64, %72 : vector<8x1xf32>
    %75 = arith.mulf %66, %72 : vector<8x1xf32>
    %76 = arith.mulf %68, %72 : vector<8x1xf32>
    %77 = vector.broadcast %24 : vector<8x1xi32> to vector<8x128xi32>
    %78 = arith.cmpi eq, %9, %77 : vector<8x128xi32>
    %cst_21 = arith.constant 0.000000e+00 : f32
    %79 = vector.shape_cast %73 : vector<8x1xf32> to vector<8x1xf32>
    %80 = vector.broadcast %79 : vector<8x1xf32> to vector<8x128xf32>
    %81 = vector.broadcast %cst_21 : f32 to vector<8x128xf32>
    %82 = arith.select %78, %80, %81 : vector<8x128xi1>, vector<8x128xf32>
    %83 = vector.broadcast %35 : vector<8x1xi32> to vector<8x128xi32>
    %84 = arith.cmpi eq, %9, %83 : vector<8x128xi32>
    %cst_22 = arith.constant 0.000000e+00 : f32
    %85 = vector.shape_cast %74 : vector<8x1xf32> to vector<8x1xf32>
    %86 = vector.broadcast %85 : vector<8x1xf32> to vector<8x128xf32>
    %87 = vector.broadcast %cst_22 : f32 to vector<8x128xf32>
    %88 = arith.select %84, %86, %87 : vector<8x128xi1>, vector<8x128xf32>
    %89 = arith.addf %82, %88 : vector<8x128xf32>
    %90 = vector.broadcast %46 : vector<8x1xi32> to vector<8x128xi32>
    %91 = arith.cmpi eq, %9, %90 : vector<8x128xi32>
    %cst_23 = arith.constant 0.000000e+00 : f32
    %92 = vector.shape_cast %75 : vector<8x1xf32> to vector<8x1xf32>
    %93 = vector.broadcast %92 : vector<8x1xf32> to vector<8x128xf32>
    %94 = vector.broadcast %cst_23 : f32 to vector<8x128xf32>
    %95 = arith.select %91, %93, %94 : vector<8x128xi1>, vector<8x128xf32>
    %96 = arith.addf %89, %95 : vector<8x128xf32>
    %97 = vector.broadcast %57 : vector<8x1xi32> to vector<8x128xi32>
    %98 = arith.cmpi eq, %9, %97 : vector<8x128xi32>
    %cst_24 = arith.constant 0.000000e+00 : f32
    %99 = vector.shape_cast %76 : vector<8x1xf32> to vector<8x1xf32>
    %100 = vector.broadcast %99 : vector<8x1xf32> to vector<8x128xf32>
    %101 = vector.broadcast %cst_24 : f32 to vector<8x128xf32>
    %102 = arith.select %98, %100, %101 : vector<8x128xi1>, vector<8x128xf32>
    %103 = arith.addf %96, %102 : vector<8x128xf32>
    %104 = arith.truncf %103 : vector<8x128xf32> to vector<8x128xbf16>
    %cst_25 = arith.constant dense<0.000000e+00> : vector<8x128xf32>
    %105 = tpu.matmul %104, %1, %cst_25 {dimension_numbers = #tpu.dot_dimension_numbers<[1], [0], [0], [1], [0, 0, 1, 1], [], []>} : vector<8x128xbf16>, vector<128x128xbf16>, vector<8x128xf32> -> vector<8x128xf32>
    %c0_26 = arith.constant 0 : index
    %c0_27 = arith.constant 0 : index
    %106 = vector.load %arg4[%c0_26, %c0_27] : memref<8x128xf32, #tpu.memory_space<vmem>>, vector<8x128xf32>
    tpu.vector_store %arg4[%c0_26, %c0_27], %105 {strides = array<i32>} : memref<8x128xf32, #tpu.memory_space<vmem>>, vector<8x128xf32>,
    %107 = arith.subf %105, %0 : vector<8x128xf32>
    %108 = arith.mulf %107, %107 : vector<8x128xf32>
    %cst_28 = arith.constant dense<0.000000e+00> : vector<8xf32>
    %109 = vector.multi_reduction <add>, %108, %cst_28 [1] : vector<8x128xf32> to vector<8xf32>
    %110 = vector.shape_cast %109 : vector<8xf32> to vector<8x1xf32>
    %111 = tpu.bitcast %110 : vector<8x1xf32> -> vector<8x1xi32>
    %112 = tpu.iota {dimensions = array<i32: 1>} : vector<8x128xi32>
    %c4_i32 = arith.constant 4 : i32
    %113 = vector.broadcast %c4_i32 : i32 to vector<8x128xi32>
    %114 = arith.cmpi eq, %112, %113 : vector<8x128xi32>
    %c0_i32 = arith.constant 0 : i32
    %115 = vector.shape_cast %111 : vector<8x1xi32> to vector<8x1xi32>
    %116 = vector.broadcast %115 : vector<8x1xi32> to vector<8x128xi32>
    %117 = vector.broadcast %c0_i32 : i32 to vector<8x128xi32>
    %118 = arith.select %114, %116, %117 : vector<8x128xi1>, vector<8x128xi32>
    %c0_i32_29 = arith.constant 0 : i32
    %119 = vector.broadcast %c0_i32_29 : i32 to vector<8x128xi32>
    %120 = arith.cmpi eq, %112, %119 : vector<8x128xi32>
    %c0_i32_30 = arith.constant 0 : i32
    %121 = vector.shape_cast %24 : vector<8x1xi32> to vector<8x1xi32>
    %122 = vector.broadcast %121 : vector<8x1xi32> to vector<8x128xi32>
    %123 = vector.broadcast %c0_i32_30 : i32 to vector<8x128xi32>
    %124 = arith.select %120, %122, %123 : vector<8x128xi1>, vector<8x128xi32>
    %125 = arith.addi %118, %124 : vector<8x128xi32>
    %c1_i32 = arith.constant 1 : i32
    %126 = vector.broadcast %c1_i32 : i32 to vector<8x128xi32>
    %127 = arith.cmpi eq, %112, %126 : vector<8x128xi32>
    %c0_i32_31 = arith.constant 0 : i32
    %128 = vector.shape_cast %35 : vector<8x1xi32> to vector<8x1xi32>
    %129 = vector.broadcast %128 : vector<8x1xi32> to vector<8x128xi32>
    %130 = vector.broadcast %c0_i32_31 : i32 to vector<8x128xi32>
    %131 = arith.select %127, %129, %130 : vector<8x128xi1>, vector<8x128xi32>
    %132 = arith.addi %125, %131 : vector<8x128xi32>
    %c2_i32 = arith.constant 2 : i32
    %133 = vector.broadcast %c2_i32 : i32 to vector<8x128xi32>
    %134 = arith.cmpi eq, %112, %133 : vector<8x128xi32>
    %c0_i32_32 = arith.constant 0 : i32
    %135 = vector.shape_cast %46 : vector<8x1xi32> to vector<8x1xi32>
    %136 = vector.broadcast %135 : vector<8x1xi32> to vector<8x128xi32>
    %137 = vector.broadcast %c0_i32_32 : i32 to vector<8x128xi32>
    %138 = arith.select %134, %136, %137 : vector<8x128xi1>, vector<8x128xi32>
    %139 = arith.addi %132, %138 : vector<8x128xi32>
    %c3_i32 = arith.constant 3 : i32
    %140 = vector.broadcast %c3_i32 : i32 to vector<8x128xi32>
    %141 = arith.cmpi eq, %112, %140 : vector<8x128xi32>
    %c0_i32_33 = arith.constant 0 : i32
    %142 = vector.shape_cast %57 : vector<8x1xi32> to vector<8x1xi32>
    %143 = vector.broadcast %142 : vector<8x1xi32> to vector<8x128xi32>
    %144 = vector.broadcast %c0_i32_33 : i32 to vector<8x128xi32>
    %145 = arith.select %141, %143, %144 : vector<8x128xi1>, vector<8x128xi32>
    %146 = arith.addi %139, %145 : vector<8x128xi32>
    %c0_34 = arith.constant 0 : index
    %c0_35 = arith.constant 0 : index
    %147 = vector.load %arg5[%c0_34, %c0_35] : memref<8x128xi32, #tpu.memory_space<vmem>>, vector<8x128xi32>
    tpu.vector_store %arg5[%c0_34, %c0_35], %146 {strides = array<i32>} : memref<8x128xi32, #tpu.memory_space<vmem>>, vector<8x128xi32>,
    return
  }
  func.func @transform_0(%arg0: i32) -> (i32, i32) {
    %c0_i32 = arith.constant 0 : i32
    %c0_i32_0 = arith.constant 0 : i32
    return %arg0, %c0_i32 : i32, i32
  }
  func.func @transform_1(%arg0: i32) -> (i32, i32) {
    %c0_i32 = arith.constant 0 : i32
    %c0_i32_0 = arith.constant 0 : i32
    %c0_i32_1 = arith.constant 0 : i32
    return %c0_i32, %c0_i32_0 : i32, i32
  }
  func.func @transform_2(%arg0: i32) -> (i32, i32) {
    %c0_i32 = arith.constant 0 : i32
    %c0_i32_0 = arith.constant 0 : i32
    %c0_i32_1 = arith.constant 0 : i32
    return %c0_i32, %c0_i32_0 : i32, i32
  }
  func.func @transform_3(%arg0: i32) -> (i32, i32) {
    %c0_i32 = arith.constant 0 : i32
    %c0_i32_0 = arith.constant 0 : i32
    return %arg0, %c0_i32 : i32, i32
  }
  func.func @transform_4(%arg0: i32) -> (i32, i32) {
    %c0_i32 = arith.constant 0 : i32
    %c0_i32_0 = arith.constant 0 : i32
    return %arg0, %c0_i32 : i32, i32
  }
}

module attributes {stable_mosaic.version = 11 : i64} {
  func.func @_vq_kernel(%arg0: i32, %arg1: memref<8x128xf32, #tpu.memory_space<vmem>>, %arg2: memref<128x128xbf16, #tpu.memory_space<vmem>>, %arg3: memref<1x128xf32, #tpu.memory_space<vmem>>, %arg4: memref<8x128xf32, #tpu.memory_space<vmem>>, %arg5: memref<8x128xi32, #tpu.memory_space<vmem>>) attributes {dimension_semantics = [#tpu.dimension_semantics<parallel>], iteration_bounds = array<i64: 1>, scalar_prefetch = 0 : i64, scratch_operands = 0 : i64, tpu.core_type = #tpu.core_type<tc>, window_params = [{transform_indices = @transform_0, window_bounds = array<i64: 8, 128>}, {pipeline_mode = #tpu.pipeline_mode<synchronous>, transform_indices = @transform_1, window_bounds = array<i64: 128, 128>}, {pipeline_mode = #tpu.pipeline_mode<synchronous>, transform_indices = @transform_2, window_bounds = array<i64: 1, 128>}, {transform_indices = @transform_3, window_bounds = array<i64: 8, 128>}, {transform_indices = @transform_4, window_bounds = array<i64: 8, 128>}]} {
    %c0 = arith.constant 0 : index
    %c0_0 = arith.constant 0 : index
    %0 = vector.load %arg1[%c0, %c0_0] : memref<8x128xf32, #tpu.memory_space<vmem>>, vector<8x128xf32>
    %c0_1 = arith.constant 0 : index
    %c0_2 = arith.constant 0 : index
    %1 = vector.load %arg2[%c0_1, %c0_2] : memref<128x128xbf16, #tpu.memory_space<vmem>>, vector<128x128xbf16>
    %cst = arith.constant 2.000000e+00 : f32
    %2 = vector.broadcast %cst : f32 to vector<8x128xf32>
    %3 = arith.mulf %2, %0 : vector<8x128xf32>
    %4 = arith.truncf %3 : vector<8x128xf32> to vector<8x128xbf16>
    %cst_3 = arith.constant dense<0.000000e+00> : vector<8x128xf32>
    %5 = tpu.matmul %4, %1, %cst_3 {dimension_numbers = #tpu.dot_dimension_numbers<[1], [1], [0], [0], [0, 0, 1, 0], [], []>} : vector<8x128xbf16>, vector<128x128xbf16>, vector<8x128xf32> -> vector<8x128xf32>
    %c0_4 = arith.constant 0 : index
    %c0_5 = arith.constant 0 : index
    %6 = vector.load %arg3[%c0_4, %c0_5] : memref<1x128xf32, #tpu.memory_space<vmem>>, vector<1x128xf32>
    %7 = vector.broadcast %6 : vector<1x128xf32> to vector<8x128xf32>
    %8 = arith.subf %7, %5 : vector<8x128xf32>
    %9 = tpu.iota {dimensions = array<i32: 1>} : vector<8x128xi32>
    %10 = arith.mulf %0, %0 : vector<8x128xf32>
    %cst_6 = arith.constant dense<0.000000e+00> : vector<8xf32>
    %11 = vector.multi_reduction <add>, %10, %cst_6 [1] : vector<8x128xf32> to vector<8xf32>
    %12 = vector.shape_cast %11 : vector<8xf32> to vector<8x1xf32>
    %13 = vector.broadcast %12 : vector<8x1xf32> to vector<8x128xf32>
    %14 = arith.addf %13, %8 : vector<8x128xf32>
    %cst_7 = arith.constant 0.000000e+00 : f32
    %15 = vector.broadcast %cst_7 : f32 to vector<8x128xf32>
    %16 = arith.maximumf %14, %15 : vector<8x128xf32>
    %17 = tpu.bitcast %16 : vector<8x128xf32> -> vector<8x128xi32>
    %c-128_i32 = arith.constant -128 : i32
    %18 = vector.broadcast %c-128_i32 : i32 to vector<8x128xi32>
    %19 = arith.andi %17, %18 : vector<8x128xi32>
    %20 = arith.ori %19, %9 : vector<8x128xi32>
    %cst_8 = arith.constant dense<2147483647> : vector<8xi32>
    %21 = vector.multi_reduction <minsi>, %20, %cst_8 [1] : vector<8x128xi32> to vector<8xi32>
    %22 = vector.shape_cast %21 : vector<8xi32> to vector<8x1xi32>
    %c127_i32 = arith.constant 127 : i32
    %23 = vector.broadcast %c127_i32 : i32 to vector<8x1xi32>
    %24 = arith.andi %22, %23 : vector<8x1xi32>
    %c-128_i32_9 = arith.constant -128 : i32
    %25 = vector.broadcast %c-128_i32_9 : i32 to vector<8x1xi32>
    %26 = arith.andi %22, %25 : vector<8x1xi32>
    %27 = tpu.bitcast %26 : vector<8x1xi32> -> vector<8x1xf32>
    %28 = vector.broadcast %22 : vector<8x1xi32> to vector<8x128xi32>
    %29 = arith.cmpi eq, %20, %28 : vector<8x128xi32>
    %c2147483647_i32 = arith.constant 2147483647 : i32
    %30 = vector.broadcast %c2147483647_i32 : i32 to vector<8x128xi32>
    %31 = arith.select %29, %30, %20 : vector<8x128xi1>, vector<8x128xi32>
    %cst_10 = arith.constant dense<2147483647> : vector<8xi32>
    %32 = vector.multi_reduction <minsi>, %31, %cst_10 [1] : vector<8x128xi32> to vector<8xi32>
    %33 = vector.shape_cast %32 : vector<8xi32> to vector<8x1xi32>
    %c127_i32_11 = arith.constant 127 : i32
    %34 = vector.broadcast %c127_i32_11 : i32 to vector<8x1xi32>
    %35 = arith.andi %33, %34 : vector<8x1xi32>
    %c-128_i32_12 = arith.constant -128 : i32
    %36 = vector.broadcast %c-128_i32_12 : i32 to vector<8x1xi32>
    %37 = arith.andi %33, %36 : vector<8x1xi32>
    %38 = tpu.bitcast %37 : vector<8x1xi32> -> vector<8x1xf32>
    %39 = vector.broadcast %33 : vector<8x1xi32> to vector<8x128xi32>
    %40 = arith.cmpi eq, %31, %39 : vector<8x128xi32>
    %c2147483647_i32_13 = arith.constant 2147483647 : i32
    %41 = vector.broadcast %c2147483647_i32_13 : i32 to vector<8x128xi32>
    %42 = arith.select %40, %41, %31 : vector<8x128xi1>, vector<8x128xi32>
    %cst_14 = arith.constant dense<2147483647> : vector<8xi32>
    %43 = vector.multi_reduction <minsi>, %42, %cst_14 [1] : vector<8x128xi32> to vector<8xi32>
    %44 = vector.shape_cast %43 : vector<8xi32> to vector<8x1xi32>
    %c127_i32_15 = arith.constant 127 : i32
    %45 = vector.broadcast %c127_i32_15 : i32 to vector<8x1xi32>
    %46 = arith.andi %44, %45 : vector<8x1xi32>
    %c-128_i32_16 = arith.constant -128 : i32
    %47 = vector.broadcast %c-128_i32_16 : i32 to vector<8x1xi32>
    %48 = arith.andi %44, %47 : vector<8x1xi32>
    %49 = tpu.bitcast %48 : vector<8x1xi32> -> vector<8x1xf32>
    %50 = vector.broadcast %44 : vector<8x1xi32> to vector<8x128xi32>
    %51 = arith.cmpi eq, %42, %50 : vector<8x128xi32>
    %c2147483647_i32_17 = arith.constant 2147483647 : i32
    %52 = vector.broadcast %c2147483647_i32_17 : i32 to vector<8x128xi32>
    %53 = arith.select %51, %52, %42 : vector<8x128xi1>, vector<8x128xi32>
    %cst_18 = arith.constant dense<2147483647> : vector<8xi32>
    %54 = vector.multi_reduction <minsi>, %53, %cst_18 [1] : vector<8x128xi32> to vector<8xi32>
    %55 = vector.shape_cast %54 : vector<8xi32> to vector<8x1xi32>
    %c127_i32_19 = arith.constant 127 : i32
    %56 = vector.broadcast %c127_i32_19 : i32 to vector<8x1xi32>
    %57 = arith.andi %55, %56 : vector<8x1xi32>
    %c-128_i32_20 = arith.constant -128 : i32
    %58 = vector.broadcast %c-128_i32_20 : i32 to vector<8x1xi32>
    %59 = arith.andi %55, %58 : vector<8x1xi32>
    %60 = tpu.bitcast %59 : vector<8x1xi32> -> vector<8x1xf32>
    %61 = arith.subf %27, %27 : vector<8x1xf32>
    %62 = math.exp %61 : vector<8x1xf32>
    %63 = arith.subf %27, %38 : vector<8x1xf32>
    %64 = math.exp %63 : vector<8x1xf32>
    %65 = arith.subf %27, %49 : vector<8x1xf32>
    %66 = math.exp %65 : vector<8x1xf32>
    %67 = arith.subf %27, %60 : vector<8x1xf32>
    %68 = math.exp %67 : vector<8x1xf32>
    %69 = arith.addf %62, %64 : vector<8x1xf32>
    %70 = arith.addf %69, %66 : vector<8x1xf32>
    %71 = arith.addf %70, %68 : vector<8x1xf32>
    %72 = tpu.reciprocal %71 {approx = true} : vector<8x1xf32> -> vector<8x1xf32>
    %73 = arith.mulf %62, %72 : vector<8x1xf32>
    %74 = arith.mulf %64, %72 : vector<8x1xf32>
    %75 = arith.mulf %66, %72 : vector<8x1xf32>
    %76 = arith.mulf %68, %72 : vector<8x1xf32>
    %77 = vector.broadcast %24 : vector<8x1xi32> to vector<8x128xi32>
    %78 = arith.cmpi eq, %9, %77 : vector<8x128xi32>
    %cst_21 = arith.constant 0.000000e+00 : f32
    %79 = vector.shape_cast %73 : vector<8x1xf32> to vector<8x1xf32>
    %80 = vector.broadcast %79 : vector<8x1xf32> to vector<8x128xf32>
    %81 = vector.broadcast %cst_21 : f32 to vector<8x128xf32>
    %82 = arith.select %78, %80, %81 : vector<8x128xi1>, vector<8x128xf32>
    %83 = vector.broadcast %35 : vector<8x1xi32> to vector<8x128xi32>
    %84 = arith.cmpi eq, %9, %83 : vector<8x128xi32>
    %cst_22 = arith.constant 0.000000e+00 : f32
    %85 = vector.shape_cast %74 : vector<8x1xf32> to vector<8x1xf32>
    %86 = vector.broadcast %85 : vector<8x1xf32> to vector<8x128xf32>
    %87 = vector.broadcast %cst_22 : f32 to vector<8x128xf32>
    %88 = arith.select %84, %86, %87 : vector<8x128xi1>, vector<8x128xf32>
    %89 = arith.addf %82, %88 : vector<8x128xf32>
    %90 = vector.broadcast %46 : vector<8x1xi32> to vector<8x128xi32>
    %91 = arith.cmpi eq, %9, %90 : vector<8x128xi32>
    %cst_23 = arith.constant 0.000000e+00 : f32
    %92 = vector.shape_cast %75 : vector<8x1xf32> to vector<8x1xf32>
    %93 = vector.broadcast %92 : vector<8x1xf32> to vector<8x128xf32>
    %94 = vector.broadcast %cst_23 : f32 to vector<8x128xf32>
    %95 = arith.select %91, %93, %94 : vector<8x128xi1>, vector<8x128xf32>
    %96 = arith.addf %89, %95 : vector<8x128xf32>
    %97 = vector.broadcast %57 : vector<8x1xi32> to vector<8x128xi32>
    %98 = arith.cmpi eq, %9, %97 : vector<8x128xi32>
    %cst_24 = arith.constant 0.000000e+00 : f32
    %99 = vector.shape_cast %76 : vector<8x1xf32> to vector<8x1xf32>
    %100 = vector.broadcast %99 : vector<8x1xf32> to vector<8x128xf32>
    %101 = vector.broadcast %cst_24 : f32 to vector<8x128xf32>
    %102 = arith.select %98, %100, %101 : vector<8x128xi1>, vector<8x128xf32>
    %103 = arith.addf %96, %102 : vector<8x128xf32>
    %104 = arith.truncf %103 : vector<8x128xf32> to vector<8x128xbf16>
    %cst_25 = arith.constant dense<0.000000e+00> : vector<8x128xf32>
    %105 = tpu.matmul %104, %1, %cst_25 {dimension_numbers = #tpu.dot_dimension_numbers<[1], [0], [0], [1], [0, 0, 1, 1], [], []>} : vector<8x128xbf16>, vector<128x128xbf16>, vector<8x128xf32> -> vector<8x128xf32>
    %c0_26 = arith.constant 0 : index
    %c0_27 = arith.constant 0 : index
    %106 = vector.load %arg4[%c0_26, %c0_27] : memref<8x128xf32, #tpu.memory_space<vmem>>, vector<8x128xf32>
    tpu.vector_store %arg4[%c0_26, %c0_27], %105 {strides = array<i32>} : memref<8x128xf32, #tpu.memory_space<vmem>>, vector<8x128xf32>,
    %107 = arith.subf %105, %0 : vector<8x128xf32>
    %108 = arith.mulf %107, %107 : vector<8x128xf32>
    %cst_28 = arith.constant dense<0.000000e+00> : vector<8xf32>
    %109 = vector.multi_reduction <add>, %108, %cst_28 [1] : vector<8x128xf32> to vector<8xf32>
    %110 = vector.shape_cast %109 : vector<8xf32> to vector<8x1xf32>
    %111 = tpu.bitcast %110 : vector<8x1xf32> -> vector<8x1xi32>
    %112 = tpu.iota {dimensions = array<i32: 1>} : vector<8x128xi32>
    %c4_i32 = arith.constant 4 : i32
    %113 = vector.broadcast %c4_i32 : i32 to vector<8x128xi32>
    %114 = arith.cmpi eq, %112, %113 : vector<8x128xi32>
    %c0_i32 = arith.constant 0 : i32
    %115 = vector.shape_cast %111 : vector<8x1xi32> to vector<8x1xi32>
    %116 = vector.broadcast %115 : vector<8x1xi32> to vector<8x128xi32>
    %117 = vector.broadcast %c0_i32 : i32 to vector<8x128xi32>
    %118 = arith.select %114, %116, %117 : vector<8x128xi1>, vector<8x128xi32>
    %c0_i32_29 = arith.constant 0 : i32
    %119 = vector.broadcast %c0_i32_29 : i32 to vector<8x128xi32>
    %120 = arith.cmpi eq, %112, %119 : vector<8x128xi32>
    %c0_i32_30 = arith.constant 0 : i32
    %121 = vector.shape_cast %24 : vector<8x1xi32> to vector<8x1xi32>
    %122 = vector.broadcast %121 : vector<8x1xi32> to vector<8x128xi32>
    %123 = vector.broadcast %c0_i32_30 : i32 to vector<8x128xi32>
    %124 = arith.select %120, %122, %123 : vector<8x128xi1>, vector<8x128xi32>
    %125 = arith.addi %118, %124 : vector<8x128xi32>
    %c1_i32 = arith.constant 1 : i32
    %126 = vector.broadcast %c1_i32 : i32 to vector<8x128xi32>
    %127 = arith.cmpi eq, %112, %126 : vector<8x128xi32>
    %c0_i32_31 = arith.constant 0 : i32
    %128 = vector.shape_cast %35 : vector<8x1xi32> to vector<8x1xi32>
    %129 = vector.broadcast %128 : vector<8x1xi32> to vector<8x128xi32>
    %130 = vector.broadcast %c0_i32_31 : i32 to vector<8x128xi32>
    %131 = arith.select %127, %129, %130 : vector<8x128xi1>, vector<8x128xi32>
    %132 = arith.addi %125, %131 : vector<8x128xi32>
    %c2_i32 = arith.constant 2 : i32
    %133 = vector.broadcast %c2_i32 : i32 to vector<8x128xi32>
    %134 = arith.cmpi eq, %112, %133 : vector<8x128xi32>
    %c0_i32_32 = arith.constant 0 : i32
    %135 = vector.shape_cast %46 : vector<8x1xi32> to vector<8x1xi32>
    %136 = vector.broadcast %135 : vector<8x1xi32> to vector<8x128xi32>
    %137 = vector.broadcast %c0_i32_32 : i32 to vector<8x128xi32>
    %138 = arith.select %134, %136, %137 : vector<8x128xi1>, vector<8x128xi32>
    %139 = arith.addi %132, %138 : vector<8x128xi32>
    %c3_i32 = arith.constant 3 : i32
    %140 = vector.broadcast %c3_i32 : i32 to vector<8x128xi32>
    %141 = arith.cmpi eq, %112, %140 : vector<8x128xi32>
    %c0_i32_33 = arith.constant 0 : i32
    %142 = vector.shape_cast %57 : vector<8x1xi32> to vector<8x1xi32>
    %143 = vector.broadcast %142 : vector<8x1xi32> to vector<8x128xi32>
    %144 = vector.broadcast %c0_i32_33 : i32 to vector<8x128xi32>
    %145 = arith.select %141, %143, %144 : vector<8x128xi1>, vector<8x128xi32>
    %146 = arith.addi %139, %145 : vector<8x128xi32>
    %c0_34 = arith.constant 0 : index
    %c0_35 = arith.constant 0 : index
    %147 = vector.load %arg5[%c0_34, %c0_35] : memref<8x128xi32, #tpu.memory_space<vmem>>, vector<8x128xi32>
    tpu.vector_store %arg5[%c0_34, %c0_35], %146 {strides = array<i32>} : memref<8x128xi32, #tpu.memory_space<vmem>>, vector<8x128xi32>,
    return
  }
  func.func @transform_0(%arg0: i32) -> (i32, i32) {
    %c0_i32 = arith.constant 0 : i32
    %c0_i32_0 = arith.constant 0 : i32
    return %arg0, %c0_i32 : i32, i32
  }
  func.func @transform_1(%arg0: i32) -> (i32, i32) {
    %c0_i32 = arith.constant 0 : i32
    %c0_i32_0 = arith.constant 0 : i32
    %c0_i32_1 = arith.constant 0 : i32
    return %c0_i32, %c0_i32_0 : i32, i32
  }
  func.func @transform_2(%arg0: i32) -> (i32, i32) {
    %c0_i32 = arith.constant 0 : i32
    %c0_i32_0 = arith.constant 0 : i32
    %c0_i32_1 = arith.constant 0 : i32
    return %c0_i32, %c0_i32_0 : i32, i32
  }
  func.func @transform_3(%arg0: i32) -> (i32, i32) {
    %c0_i32 = arith.constant 0 : i32
    %c0_i32_0 = arith.constant 0 : i32
    return %arg0, %c0_i32 : i32, i32
  }
  func.func @transform_4(%arg0: i32) -> (i32, i32) {
    %c0_i32 = arith.constant 0 : i32
    %c0_i32_0 = arith.constant 0 : i32
    return %arg0, %c0_i32 : i32, i32
  }
}

</mosaic_0001>

<bundles_post_ra>
// kernel: tpu_custom_call.1
= control target key start
LH: loop header
LB: loop body
LE: loop exit
PB: predicated region body
PF: predicated region fallthrough
CT: control target
= control target key end

     0   :  { %10 = vsyncpa [#allocation3], 0  ;;  %s684_s0 = inlined_call_operand.hbm [shape: f32[8,128], index: 0, kind: input, shape index: {}]   ;;  %s685_s1 = inlined_call_operand.hbm [shape: bf16[128,128], index: 1, kind: input, shape index: {}]   ;;  %s686_s2 = inlined_call_operand.vmem [shape: f32[1,128], index: 2, kind: input, shape index: {}]   ;;  %s687_s3 = inlined_call_operand.hbm [shape: f32[8,128], index: 3, kind: output, shape index: {0}]   ;;  %s688_s4 = inlined_call_operand.hbm [shape: s32[8,128], index: 4, kind: output, shape index: {1}]  }
   0x1   :  { %11 = vsyncpa [#allocation6], 0 }
   0x2   :  { %12 = vsyncpa [#allocation4], 0 }
   0x3   :  { %13 = vsyncpa [#allocation9], 0  ;;  %s556_s15 = smov [#allocation2]   ;;  %s557_s17 = smov [#allocation5]  }
   0x4   :  { %s20_s16 = sshll.u32 %s556_s15, 4  ;;  %s29_s18 = sshll.u32 %s557_s17, 4  ;;  %s21_s16 = int_to_ptr.vmem [resolvable:$true] %s20_s16  ;;  %s589_s18 = int_to_ptr.vmem [resolvable:$true] %s29_s18 }
   0x5   :  { %s460_s21 = scalar_lea.hbm %s684_s0, 128 }
   0x6   :  { %p461_p0 = scmp.ne.s32.totalorder %s684_s0, %s460_s21  ;;  %p464_p1 = scmp.lt.u32.totalorder %s460_s21, %s684_s0 }
   0x8   :  { %p466_p2 = pnand %p464_p1, %p461_p0 }
   0xa   :  { %469 = shalt.err (!%p466_p2)
}
   0xb   :  { %s470_s26 = scalar_lea.vmem %s21_s16, 128  ;;  %p475_p4 = scmp.lt.s32.totalorder %s21_s16, %s21_s16 }
   0xc   :  { %p471_p3 = scmp.ne.s32.totalorder %s21_s16, %s470_s26  ;;  %p476_p5 = scmp.lt.s32.totalorder %s470_s26, %s470_s26 }
   0xe   :  { %p477_p6 = por %p476_p5, %p475_p4 }
  0x10   :  { %p478_p7 = pnand %p477_p6, %p471_p3 }
  0x12   :  { %481 = shalt.err (!%p478_p7)
}
  0x13   :  { %23 = dma.hbm_to_vmem [thread:$0]  %s684_s0, 128, %s21_s16, [#allocation3]  }
  0x14   :  { %s482_s5 = scalar_lea.hbm %s685_s1, 1024 }
  0x15   :  { %p483_p8 = scmp.ne.s32.totalorder %s685_s1, %s482_s5  ;;  %p486_p9 = scmp.lt.u32.totalorder %s482_s5, %s685_s1 }
  0x17   :  { %p488_p10 = pnand %p486_p9, %p483_p8 }
  0x19   :  { %491 = shalt.err (!%p488_p10)
}
  0x1a   :  { %s492_s10 = scalar_lea.vmem %s589_s18, 1024  ;;  %p497_p12 = scmp.lt.s32.totalorder %s589_s18, %s589_s18 }
  0x1b   :  { %p493_p11 = scmp.ne.s32.totalorder %s589_s18, %s492_s10  ;;  %p498_p13 = scmp.lt.s32.totalorder %s492_s10, %s492_s10 }
  0x1d   :  { %p499_p0 = por %p498_p13, %p497_p12 }
  0x1f   :  { %p500_p1 = pnand %p499_p0, %p493_p11 }
  0x21   :  { %503 = shalt.err (!%p500_p1)
}
  0x22   :  { %s558_s0 = smov 64   ;;  %s559_s11 = smov 4  }
  0x23   :  { %35 = dma.hbm_to_vmem [thread:$0]  %s685_s1, 1024, %s589_s18, [#allocation6], %s558_s0, %s558_s0, %s559_s11  }
  0x24   :  { %548 = dma.done.wait [#allocation3], 128  }
  0x25   :  { %549 = vsyncadd [#allocation3], 4294967168 }
  0x26   :  { %550 = dma.done.wait [#allocation6], 1024  }
  0x27   :  { %551 = vsyncadd [#allocation6], 4294966272  ;;  %v560_v0 = vmov 0.0   ;;  %vm561_vm0 = vmmov 0   ;;  %v442_v1 = vld [vmem:[#allocation5] sm:$0xff]   ;;  %v443_v2 = vld [vmem:[#allocation5 + $0x8] sm:$0xff]   ;;  %v160_v18 = vlaneseq }
  0x28   :  { %394 = vmatprep.subr.bf16.mxu0 %v560_v0  ;;  %410 = vmatprep.mubr.msk.bf16.mxu0 %vm561_vm0, %v560_v0  ;;  %v444_v3 = vld [vmem:[#allocation5 + $0x10] sm:$0xff]   ;;  %v620_v4 = vld [vmem:[#allocation2] sm:$0xff]  ;;  %v446_v7 = vld [vmem:[#allocation5 + $0x20] sm:$0xff]  }
  0x29   :  { %414 = vmatprep.subr.bf16.mxu1 %v560_v0  ;;  %430 = vmatprep.mubr.msk.bf16.mxu1 %vm561_vm0, %v560_v0  ;;  %v162_v5 = vmul.f32 %v620_v4, %v620_v4  ;;  %v445_v6 = vld [vmem:[#allocation5 + $0x18] sm:$0xff]   ;;  %v447_v8 = vld [vmem:[#allocation5 + $0x28] sm:$0xff]   ;;  %v448_v9 = vld [vmem:[#allocation5 + $0x30] sm:$0xff]   ;;  %v62_v11 = vmul.f32 2.0, %v620_v4  ;;  %v628_v22 = vand.u32 127, %v160_v18 }
  0x2a   :  { %395 = vmatpush3.bf16.xpose.msra.mxu0 %v442_v1  ;;  %415 = vmatpush3.bf16.msra.mxu1 %v442_v1  ;;  %v449_v10 = vld [vmem:[#allocation5 + $0x38] sm:$0xff]  }
  0x2b   :  { %396 = vmatprep.subr.bf16.mxu0 %v560_v0  ;;  %416 = vmatprep.subr.bf16.mxu1 %v560_v0  ;;  %v63_v12 = vpack.c.bf16 %v62_v11, %v62_v11  ;;  %v375_v13 = vld [vmem:[%s686_s2] ss:$0 sm:$0xff]  ;;  %s562_s2 = smov [#allocation7]  }
  0x2c   :  { %163 = vadd.xlane.f32.xlu0 %v162_v5  ;;  %s343_s15 = sshll.u32 %s562_s2, 4  ;;  %s344_s15 = int_to_ptr.vmem [resolvable:$true] %s343_s15 }
  0x2d   :  { %s504_s16 = scalar_lea.vmem %s344_s15, 128  ;;  %p509_p3 = scmp.lt.s32.totalorder %s344_s15, %s344_s15 }
  0x2e   :  { %417 = vmatpush3.bf16.msra.mxu1 %v443_v2  ;;  %p505_p2 = scmp.ne.s32.totalorder %s344_s15, %s504_s16  ;;  %p510_p4 = scmp.lt.s32.totalorder %s504_s16, %s504_s16 }
  0x2f   :  { %418 = vmatprep.subr.bf16.mxu1 %v560_v0 }
  0x30   :  { %p511_p5 = por %p510_p4, %p509_p3 }
  0x32   :  { %397 = vmatpush3.bf16.xpose.msra.mxu0 %v443_v2  ;;  %419 = vmatpush3.bf16.msra.mxu1 %v444_v3  ;;  %p512_p6 = pnand %p511_p5, %p505_p2 }
  0x33   :  { %398 = vmatprep.subr.bf16.mxu0 %v560_v0  ;;  %420 = vmatprep.subr.bf16.mxu1 %v560_v0 }
  0x36   :  { %421 = vmatpush3.bf16.msra.mxu1 %v445_v6 }
  0x37   :  { %422 = vmatprep.subr.bf16.mxu1 %v560_v0 }
  0x3a   :  { %399 = vmatpush3.bf16.xpose.msra.mxu0 %v444_v3  ;;  %423 = vmatpush3.bf16.msra.mxu1 %v446_v7 }
  0x3b   :  { %400 = vmatprep.subr.bf16.mxu0 %v560_v0  ;;  %424 = vmatprep.subr.bf16.mxu1 %v560_v0 }
  0x3e   :  { %425 = vmatpush3.bf16.msra.mxu1 %v447_v8 }
  0x3f   :  { %426 = vmatprep.subr.bf16.mxu1 %v560_v0 }
  0x42   :  { %401 = vmatpush3.bf16.xpose.msra.mxu0 %v445_v6  ;;  %427 = vmatpush3.bf16.msra.mxu1 %v448_v9 }
  0x43   :  { %402 = vmatprep.subr.bf16.mxu0 %v560_v0  ;;  %428 = vmatprep.subr.bf16.mxu1 %v560_v0 }
  0x46   :  { %429 = vmatpush3.bf16.msra.mxu1 %v449_v10 }
  0x4a   :  { %403 = vmatpush3.bf16.xpose.msra.mxu0 %v446_v7 }
  0x4b   :  { %404 = vmatprep.subr.bf16.mxu0 %v560_v0 }
  0x52   :  { %405 = vmatpush3.bf16.xpose.msra.mxu0 %v447_v8 }
  0x53   :  { %406 = vmatprep.subr.bf16.mxu0 %v560_v0 }
  0x5a   :  { %407 = vmatpush3.bf16.xpose.msra.mxu0 %v448_v9 }
  0x5b   :  { %408 = vmatprep.subr.bf16.mxu0 %v560_v0 }
  0x62   :  { %409 = vmatpush3.bf16.xpose.msra.mxu0 %v449_v10 }
  0x69   :  { %411 = vmatmul.mubr.bf16.vlgmr.msra.gmra.mrb[0].mxu0 %v63_v12 }
  0xb9   :  { %v164_v15 = vpop.xlane.xlu0 %163 }
 0x13c   :  { %v146_v14 = vpop.f32.mrb[0].mxu0 }
 0x13d   :  { %v159_v16 = vsub.f32 %v375_v13, %v146_v14  ;;  %v412_v17 = vpop.f32.mrb[1].mxu0 }
 0x13e   :  { %v149_v19 = vpop.f32.mrb[2].mxu0 }
 0x13f   :  { %v165_v20 = vadd.f32 %v164_v15, %v159_v16  ;;  %v413_v21 = vpop.f32.mrb[3].mxu0 }
 0x141   :  { %v166_v23 = vmax.f32 %v165_v20, 0.0 }
 0x143   :  { %v168_v24 = vand.u32 4294967168, %v166_v23 }
 0x145   :  { %v169_v25 = vor.u32 %v168_v24, %v628_v22 }
 0x147   :  { %v171_v26 = vshra.s32 %v169_v25, 16  ;;  %v170_v28 = vand.u32 65535, %v169_v25 }
 0x149   :  { %v173_v27 = vcvt.s32.f32 %v171_v26  ;;  %v172_v30 = vcvt.s32.f32 %v170_v28 }
 0x14b   :  { %174 = vmin.xlane.f32.xlu0 %v173_v27 }
 0x1d8   :  { %v175_v29 = vpop.xlane.xlu0 %174 }
 0x1d9   :  { %vm176_vm1 = vcmp.eq.f32.partialorder %v173_v27, %v175_v29  ;;  %v181_v32 = vcvt.f32.s32 %v175_v29 }
 0x1da   :  { %v177_v31 = vsel %vm176_vm1, %v172_v30, inf }
 0x1db   :  { %178 = vmin.xlane.f32.xlu1 %v177_v31  ;;  %v182_v34 = vshll.u32 %v181_v32, 16 }
 0x268   :  { %v179_v33 = vpop.xlane.xlu1 %178 }
 0x269   :  { %v180_v35 = vcvt.f32.s32 %v179_v33 }
 0x26b   :  { %v631_v36 = vadd.s32 %v182_v34, %v180_v35 }
 0x26d   :  { %vm187_vm2 = vcmp.eq.s32.totalorder %v169_v25, %v631_v36  ;;  %v185_v45 = vand.u32 4294967168, %v631_v36  ;;  %v184_v30 = vand.u32 127, %v631_v36 }
 0x26e   :  { %v188_v37 = vsel %vm187_vm2, 2147483647, %v169_v25 }
 0x26f   :  { %v190_v38 = vshra.s32 %v188_v37, 16  ;;  %v189_v40 = vand.u32 65535, %v188_v37  ;;  %v244_v49 = vsub.f32 %v185_v45, %v185_v45  ;;  %vm264_vm8 = vcmp.eq.s32.totalorder %v628_v22, %v184_v30 }
 0x271   :  { %v192_v39 = vcvt.s32.f32 %v190_v38  ;;  %v191_v42 = vcvt.s32.f32 %v189_v40  ;;  %v245_v52 = vmul.f32 1.442695, %v244_v49 }
 0x273   :  { %193 = vmin.xlane.f32.xlu1 %v192_v39  ;;  %450 = vpow2.f32 %v245_v52 }
 0x27d   :  { %v451_v58 = vpop.eup %450 }
 0x300   :  { %v194_v41 = vpop.xlane.xlu1 %193 }
 0x301   :  { %vm195_vm3 = vcmp.eq.f32.partialorder %v192_v39, %v194_v41  ;;  %v200_v44 = vcvt.f32.s32 %v194_v41 }
 0x302   :  { %v196_v43 = vsel %vm195_vm3, %v191_v42, inf }
 0x303   :  { %197 = vmin.xlane.f32.xlu0 %v196_v43  ;;  %v201_v47 = vshll.u32 %v200_v44, 16 }
 0x390   :  { %v198_v46 = vpop.xlane.xlu0 %197 }
 0x391   :  { %v199_v48 = vcvt.f32.s32 %v198_v46 }
 0x393   :  { %v635_v50 = vadd.s32 %v201_v47, %v199_v48 }
 0x395   :  { %v204_v51 = vand.u32 4294967168, %v635_v50  ;;  %vm206_vm4 = vcmp.eq.s32.totalorder %v188_v37, %v635_v50  ;;  %v203_v31 = vand.u32 127, %v635_v50 }
 0x396   :  { %v207_v53 = vsel %vm206_vm4, 2147483647, %v188_v37 }
 0x397   :  { %v247_v54 = vsub.f32 %v185_v45, %v204_v51  ;;  %v209_v55 = vshra.s32 %v207_v53, 16  ;;  %v208_v61 = vand.u32 65535, %v207_v53  ;;  %vm266_vm9 = vcmp.eq.s32.totalorder %v628_v22, %v203_v31 }
 0x399   :  { %v248_v56 = vmul.f32 1.442695, %v247_v54  ;;  %v211_v57 = vcvt.s32.f32 %v209_v55  ;;  %v210_v63 = vcvt.s32.f32 %v208_v61 }
 0x39b   :  { %452 = vpow2.f32 %v248_v56  ;;  %212 = vmin.xlane.f32.xlu1 %v211_v57 }
 0x3a5   :  { %v453_v59 = vpop.eup %452 }
 0x3a6   :  { %v256_v60 = vadd.f32 %v453_v59, %v451_v58 }
 0x428   :  { %v213_v62 = vpop.xlane.xlu1 %212 }
 0x429   :  { %vm214_vm5 = vcmp.eq.f32.partialorder %v211_v57, %v213_v62  ;;  %v219_v1 = vcvt.f32.s32 %v213_v62 }
 0x42a   :  { %v215_v0 = vsel %vm214_vm5, %v210_v63, inf }
 0x42b   :  { %216 = vmin.xlane.f32.xlu0 %v215_v0  ;;  %v220_v3 = vshll.u32 %v219_v1, 16 }
 0x4b8   :  { %v217_v2 = vpop.xlane.xlu0 %216 }
 0x4b9   :  { %v218_v5 = vcvt.f32.s32 %v217_v2 }
 0x4bb   :  { %v639_v6 = vadd.s32 %v220_v3, %v218_v5 }
 0x4bd   :  { %v223_v7 = vand.u32 4294967168, %v639_v6  ;;  %vm225_vm6 = vcmp.eq.s32.totalorder %v207_v53, %v639_v6  ;;  %v222_v32 = vand.u32 127, %v639_v6 }
 0x4be   :  { %v226_v8 = vsel %vm225_vm6, 2147483647, %v207_v53 }
 0x4bf   :  { %v250_v9 = vsub.f32 %v185_v45, %v223_v7  ;;  %v228_v10 = vshra.s32 %v226_v8, 16  ;;  %v227_v15 = vand.u32 65535, %v226_v8  ;;  %vm269_vm10 = vcmp.eq.s32.totalorder %v628_v22, %v222_v32 }
 0x4c1   :  { %v251_v11 = vmul.f32 1.442695, %v250_v9  ;;  %v230_v12 = vcvt.s32.f32 %v228_v10  ;;  %v229_v17 = vcvt.s32.f32 %v227_v15 }
 0x4c3   :  { %454 = vpow2.f32 %v251_v11  ;;  %231 = vmin.xlane.f32.xlu1 %v230_v12 }
 0x4cd   :  { %v455_v13 = vpop.eup %454 }
 0x4ce   :  { %v257_v14 = vadd.f32 %v455_v13, %v256_v60 }
 0x550   :  { %v232_v16 = vpop.xlane.xlu1 %231 }
 0x551   :  { %vm233_vm7 = vcmp.eq.f32.partialorder %v230_v12, %v232_v16  ;;  %v238_v19 = vcvt.f32.s32 %v232_v16 }
 0x552   :  { %v234_v18 = vsel %vm233_vm7, %v229_v17, inf }
 0x553   :  { %235 = vmin.xlane.f32.xlu0 %v234_v18  ;;  %v239_v21 = vshll.u32 %v238_v19, 16 }
 0x5e0   :  { %v236_v20 = vpop.xlane.xlu0 %235 }
 0x5e1   :  { %v237_v23 = vcvt.f32.s32 %v236_v20 }
 0x5e3   :  { %v643_v24 = vadd.s32 %v239_v21, %v237_v23 }
 0x5e5   :  { %v242_v25 = vand.u32 4294967168, %v643_v24  ;;  %v241_v39 = vand.u32 127, %v643_v24 }
 0x5e7   :  { %v253_v26 = vsub.f32 %v185_v45, %v242_v25  ;;  %vm272_vm11 = vcmp.eq.s32.totalorder %v628_v22, %v241_v39 }
 0x5e9   :  { %v254_v27 = vmul.f32 1.442695, %v253_v26 }
 0x5eb   :  { %456 = vpow2.f32 %v254_v27 }
 0x5f5   :  { %v457_v28 = vpop.eup %456 }
 0x5f6   :  { %v258_v29 = vadd.f32 %v457_v28, %v257_v14 }
 0x5f8   :  { %458 = vrcp.f32 %v258_v29 }
 0x602   :  { %v459_v33 = vpop.eup %458 }
 0x603   :  { %v260_v34 = vmul.f32 %v459_v33, %v451_v58  ;;  %v261_v35 = vmul.f32 %v459_v33, %v453_v59  ;;  %v262_v37 = vmul.f32 %v459_v33, %v455_v13  ;;  %v263_v38 = vmul.f32 %v459_v33, %v457_v28 }
 0x605   :  { %v265_v40 = vsel %vm264_vm8, %v260_v34, 0.0  ;;  %v267_v41 = vsel %vm266_vm9, %v261_v35, 0.0  ;;  %v270_v36 = vsel %vm269_vm10, %v262_v37, 0.0  ;;  %v273_v44 = vsel %vm272_vm11, %v263_v38, 0.0 }
 0x606   :  { %v268_v42 = vadd.f32 %v267_v41, %v265_v40 }
 0x608   :  { %v271_v43 = vadd.f32 %v270_v36, %v268_v42 }
 0x60a   :  { %v274_v45 = vadd.f32 %v273_v44, %v271_v43 }
 0x60c   :  { %v275_v46 = vpack.c.bf16 %v274_v45, %v274_v45 }
 0x60e   :  { %431 = vmatmul.mubr.bf16.vlgmr.msra.gmra.mrb[0].mxu1 %v275_v46 }
 0x6e1   :  { %v310_v47 = vpop.f32.mrb[0].mxu1 }
 0x6e2   :  { %v317_v48 = vsub.f32 %v310_v47, %v620_v4  ;;  %316 = vst [vmem:[#allocation7] sm:$0xff] %v310_v47  ;;  %v432_v49 = vpop.f32.mrb[1].mxu1 }
 0x6e3   :  { %v313_v50 = vpop.f32.mrb[2].mxu1 }
 0x6e4   :  { %v433_v51 = vpop.f32.mrb[3].mxu1  ;;  %v318_v52 = vmul.f32 %v317_v48, %v317_v48 }
 0x6e6   :  { %319 = vadd.xlane.f32.xlu1 %v318_v52 }
 0x6e7   :  { %515 = shalt.err (!%p512_p6)
}
 0x6e8   :  { %s516_s19 = scalar_lea.hbm %s687_s3, 128 }
 0x6e9   :  { %p517_p7 = scmp.ne.s32.totalorder %s687_s3, %s516_s19  ;;  %p520_p8 = scmp.lt.u32.totalorder %s516_s19, %s687_s3 }
 0x6eb   :  { %p522_p9 = pnand %p520_p8, %p517_p7 }
 0x6ed   :  { %525 = shalt.err (!%p522_p9)
}
 0x6ee   :  { %346 = dma.vmem_to_hbm [thread:$0]  %s344_s15, 128, %s687_s3, [#allocation4]   ;;  %vm322_vm12 = vcmp.eq.s32.totalorder %v628_v22, 4  ;;  %vm324_vm13 = vcmp.eq.s32.totalorder %v628_v22, 0  ;;  %vm327_vm14 = vcmp.eq.s32.totalorder %v628_v22, 1  ;;  %vm330_vm15 = vcmp.eq.s32.totalorder %v628_v22, 2 }
 0x6ef   :  { %v325_v53 = vsel %vm324_vm13, %v184_v30, 0  ;;  %v328_v56 = vsel %vm327_vm14, %v203_v31, 0  ;;  %vm333_vm0 = vcmp.eq.s32.totalorder %v628_v22, 3  ;;  %v331_v58 = vsel %vm330_vm15, %v222_v32, 0  ;;  %s563_s26 = smov [#allocation8]  }
 0x6f0   :  { %s353_s27 = sshll.u32 %s563_s26, 4  ;;  %v334_v60 = vsel %vm333_vm0, %v241_v39, 0  ;;  %s354_s27 = int_to_ptr.vmem [resolvable:$true] %s353_s27 }
 0x6f1   :  { %s526_s3 = scalar_lea.vmem %s354_s27, 128  ;;  %p531_p11 = scmp.lt.s32.totalorder %s354_s27, %s354_s27 }
 0x6f2   :  { %p527_p10 = scmp.ne.s32.totalorder %s354_s27, %s526_s3  ;;  %p532_p12 = scmp.lt.s32.totalorder %s526_s3, %s526_s3 }
 0x6f4   :  { %p533_p13 = por %p532_p12, %p531_p11 }
 0x6f6   :  { %p534_p0 = pnand %p533_p13, %p527_p10 }
 0x773   :  { %v320_v4 = vpop.xlane.xlu1 %319 }
 0x774   :  { %v323_v54 = vsel %vm322_vm12, %v320_v4, 0 }
 0x775   :  { %v326_v55 = vadd.s32 %v325_v53, %v323_v54 }
 0x777   :  { %v329_v57 = vadd.s32 %v328_v56, %v326_v55 }
 0x779   :  { %v332_v59 = vadd.s32 %v331_v58, %v329_v57 }
 0x77b   :  { %v335_v61 = vadd.s32 %v334_v60, %v332_v59 }
 0x77d   :  { %336 = vst [vmem:[#allocation8] sm:$0xff] %v335_v61 }
 0x77e   :  { %537 = shalt.err (!%p534_p0)
}
 0x77f   :  { %s538_s30 = scalar_lea.hbm %s688_s4, 128 }
 0x780   :  { %p539_p1 = scmp.ne.s32.totalorder %s688_s4, %s538_s30  ;;  %p542_p2 = scmp.lt.u32.totalorder %s538_s30, %s688_s4 }
 0x782   :  { %p544_p3 = pnand %p542_p2, %p539_p1 }
 0x784   :  { %547 = shalt.err (!%p544_p3)
}
 0x785   :  { %356 = dma.vmem_to_hbm [thread:$0]  %s354_s27, 128, %s688_s4, [#allocation9]  }
 0x786   :  { %552 = dma.done.wait [#allocation4], 128  }
 0x787   :  { %553 = vsyncadd [#allocation4], 4294967168 }
 0x788   :  { %554 = dma.done.wait [#allocation9], 128  }
 0x789   :  { %555 = vsyncadd [#allocation9], 4294967168 }
 0x78a   :  { %363 = vsyncpa [#allocation3], 1 }
 0x78b   :  { %364 = vsyncpa [#allocation6], 1 }
 0x78c   :  { %365 = vsyncpa [#allocation4], 1 }
 0x78d   :  { %366 = vsyncpa [#allocation9], 1 }

// kernel: tpu_custom_call.1
= control target key start
LH: loop header
LB: loop body
LE: loop exit
PB: predicated region body
PF: predicated region fallthrough
CT: control target
= control target key end

     0   :  { %10 = vsyncpa [#allocation3], 0  ;;  %s684_s0 = inlined_call_operand.hbm [shape: f32[8,128], index: 0, kind: input, shape index: {}]   ;;  %s685_s1 = inlined_call_operand.hbm [shape: bf16[128,128], index: 1, kind: input, shape index: {}]   ;;  %s686_s2 = inlined_call_operand.vmem [shape: f32[1,128], index: 2, kind: input, shape index: {}]   ;;  %s687_s3 = inlined_call_operand.hbm [shape: f32[8,128], index: 3, kind: output, shape index: {0}]   ;;  %s688_s4 = inlined_call_operand.hbm [shape: s32[8,128], index: 4, kind: output, shape index: {1}]  }
   0x1   :  { %11 = vsyncpa [#allocation6], 0 }
   0x2   :  { %12 = vsyncpa [#allocation4], 0 }
   0x3   :  { %13 = vsyncpa [#allocation9], 0  ;;  %s556_s15 = smov [#allocation2]   ;;  %s557_s17 = smov [#allocation5]  }
   0x4   :  { %s20_s16 = sshll.u32 %s556_s15, 4  ;;  %s29_s18 = sshll.u32 %s557_s17, 4  ;;  %s21_s16 = int_to_ptr.vmem [resolvable:$true] %s20_s16  ;;  %s589_s18 = int_to_ptr.vmem [resolvable:$true] %s29_s18 }
   0x5   :  { %s460_s21 = scalar_lea.hbm %s684_s0, 128 }
   0x6   :  { %p461_p0 = scmp.ne.s32.totalorder %s684_s0, %s460_s21  ;;  %p464_p1 = scmp.lt.u32.totalorder %s460_s21, %s684_s0 }
   0x8   :  { %p466_p2 = pnand %p464_p1, %p461_p0 }
   0xa   :  { %469 = shalt.err (!%p466_p2)
}
   0xb   :  { %s470_s26 = scalar_lea.vmem %s21_s16, 128  ;;  %p475_p4 = scmp.lt.s32.totalorder %s21_s16, %s21_s16 }
   0xc   :  { %p471_p3 = scmp.ne.s32.totalorder %s21_s16, %s470_s26  ;;  %p476_p5 = scmp.lt.s32.totalorder %s470_s26, %s470_s26 }
   0xe   :  { %p477_p6 = por %p476_p5, %p475_p4 }
  0x10   :  { %p478_p7 = pnand %p477_p6, %p471_p3 }
  0x12   :  { %481 = shalt.err (!%p478_p7)
}
  0x13   :  { %23 = dma.hbm_to_vmem [thread:$0]  %s684_s0, 128, %s21_s16, [#allocation3]  }
  0x14   :  { %s482_s5 = scalar_lea.hbm %s685_s1, 1024 }
  0x15   :  { %p483_p8 = scmp.ne.s32.totalorder %s685_s1, %s482_s5  ;;  %p486_p9 = scmp.lt.u32.totalorder %s482_s5, %s685_s1 }
  0x17   :  { %p488_p10 = pnand %p486_p9, %p483_p8 }
  0x19   :  { %491 = shalt.err (!%p488_p10)
}
  0x1a   :  { %s492_s10 = scalar_lea.vmem %s589_s18, 1024  ;;  %p497_p12 = scmp.lt.s32.totalorder %s589_s18, %s589_s18 }
  0x1b   :  { %p493_p11 = scmp.ne.s32.totalorder %s589_s18, %s492_s10  ;;  %p498_p13 = scmp.lt.s32.totalorder %s492_s10, %s492_s10 }
  0x1d   :  { %p499_p0 = por %p498_p13, %p497_p12 }
  0x1f   :  { %p500_p1 = pnand %p499_p0, %p493_p11 }
  0x21   :  { %503 = shalt.err (!%p500_p1)
}
  0x22   :  { %s558_s0 = smov 64   ;;  %s559_s11 = smov 4  }
  0x23   :  { %35 = dma.hbm_to_vmem [thread:$0]  %s685_s1, 1024, %s589_s18, [#allocation6], %s558_s0, %s558_s0, %s559_s11  }
  0x24   :  { %548 = dma.done.wait [#allocation3], 128  }
  0x25   :  { %549 = vsyncadd [#allocation3], 4294967168 }
  0x26   :  { %550 = dma.done.wait [#allocation6], 1024  }
  0x27   :  { %551 = vsyncadd [#allocation6], 4294966272  ;;  %v560_v0 = vmov 0.0   ;;  %vm561_vm0 = vmmov 0   ;;  %v442_v1 = vld [vmem:[#allocation5] sm:$0xff]   ;;  %v443_v2 = vld [vmem:[#allocation5 + $0x8] sm:$0xff]   ;;  %v160_v18 = vlaneseq }
  0x28   :  { %394 = vmatprep.subr.bf16.mxu0 %v560_v0  ;;  %410 = vmatprep.mubr.msk.bf16.mxu0 %vm561_vm0, %v560_v0  ;;  %v444_v3 = vld [vmem:[#allocation5 + $0x10] sm:$0xff]   ;;  %v620_v4 = vld [vmem:[#allocation2] sm:$0xff]  ;;  %v446_v7 = vld [vmem:[#allocation5 + $0x20] sm:$0xff]  }
  0x29   :  { %414 = vmatprep.subr.bf16.mxu1 %v560_v0  ;;  %430 = vmatprep.mubr.msk.bf16.mxu1 %vm561_vm0, %v560_v0  ;;  %v162_v5 = vmul.f32 %v620_v4, %v620_v4  ;;  %v445_v6 = vld [vmem:[#allocation5 + $0x18] sm:$0xff]   ;;  %v447_v8 = vld [vmem:[#allocation5 + $0x28] sm:$0xff]   ;;  %v448_v9 = vld [vmem:[#allocation5 + $0x30] sm:$0xff]   ;;  %v62_v11 = vmul.f32 2.0, %v620_v4  ;;  %v628_v22 = vand.u32 127, %v160_v18 }
  0x2a   :  { %395 = vmatpush3.bf16.xpose.msra.mxu0 %v442_v1  ;;  %415 = vmatpush3.bf16.msra.mxu1 %v442_v1  ;;  %v449_v10 = vld [vmem:[#allocation5 + $0x38] sm:$0xff]  }
  0x2b   :  { %396 = vmatprep.subr.bf16.mxu0 %v560_v0  ;;  %416 = vmatprep.subr.bf16.mxu1 %v560_v0  ;;  %v63_v12 = vpack.c.bf16 %v62_v11, %v62_v11  ;;  %v375_v13 = vld [vmem:[%s686_s2] ss:$0 sm:$0xff]  ;;  %s562_s2 = smov [#allocation7]  }
  0x2c   :  { %163 = vadd.xlane.f32.xlu0 %v162_v5  ;;  %s343_s15 = sshll.u32 %s562_s2, 4  ;;  %s344_s15 = int_to_ptr.vmem [resolvable:$true] %s343_s15 }
  0x2d   :  { %s504_s16 = scalar_lea.vmem %s344_s15, 128  ;;  %p509_p3 = scmp.lt.s32.totalorder %s344_s15, %s344_s15 }
  0x2e   :  { %417 = vmatpush3.bf16.msra.mxu1 %v443_v2  ;;  %p505_p2 = scmp.ne.s32.totalorder %s344_s15, %s504_s16  ;;  %p510_p4 = scmp.lt.s32.totalorder %s504_s16, %s504_s16 }
  0x2f   :  { %418 = vmatprep.subr.bf16.mxu1 %v560_v0 }
  0x30   :  { %p511_p5 = por %p510_p4, %p509_p3 }
  0x32   :  { %397 = vmatpush3.bf16.xpose.msra.mxu0 %v443_v2  ;;  %419 = vmatpush3.bf16.msra.mxu1 %v444_v3  ;;  %p512_p6 = pnand %p511_p5, %p505_p2 }
  0x33   :  { %398 = vmatprep.subr.bf16.mxu0 %v560_v0  ;;  %420 = vmatprep.subr.bf16.mxu1 %v560_v0 }
  0x36   :  { %421 = vmatpush3.bf16.msra.mxu1 %v445_v6 }
  0x37   :  { %422 = vmatprep.subr.bf16.mxu1 %v560_v0 }
  0x3a   :  { %399 = vmatpush3.bf16.xpose.msra.mxu0 %v444_v3  ;;  %423 = vmatpush3.bf16.msra.mxu1 %v446_v7 }
  0x3b   :  { %400 = vmatprep.subr.bf16.mxu0 %v560_v0  ;;  %424 = vmatprep.subr.bf16.mxu1 %v560_v0 }
  0x3e   :  { %425 = vmatpush3.bf16.msra.mxu1 %v447_v8 }
  0x3f   :  { %426 = vmatprep.subr.bf16.mxu1 %v560_v0 }
  0x42   :  { %401 = vmatpush3.bf16.xpose.msra.mxu0 %v445_v6  ;;  %427 = vmatpush3.bf16.msra.mxu1 %v448_v9 }
  0x43   :  { %402 = vmatprep.subr.bf16.mxu0 %v560_v0  ;;  %428 = vmatprep.subr.bf16.mxu1 %v560_v0 }
  0x46   :  { %429 = vmatpush3.bf16.msra.mxu1 %v449_v10 }
  0x4a   :  { %403 = vmatpush3.bf16.xpose.msra.mxu0 %v446_v7 }
  0x4b   :  { %404 = vmatprep.subr.bf16.mxu0 %v560_v0 }
  0x52   :  { %405 = vmatpush3.bf16.xpose.msra.mxu0 %v447_v8 }
  0x53   :  { %406 = vmatprep.subr.bf16.mxu0 %v560_v0 }
  0x5a   :  { %407 = vmatpush3.bf16.xpose.msra.mxu0 %v448_v9 }
  0x5b   :  { %408 = vmatprep.subr.bf16.mxu0 %v560_v0 }
  0x62   :  { %409 = vmatpush3.bf16.xpose.msra.mxu0 %v449_v10 }
  0x69   :  { %411 = vmatmul.mubr.bf16.vlgmr.msra.gmra.mrb[0].mxu0 %v63_v12 }
  0xb9   :  { %v164_v15 = vpop.xlane.xlu0 %163 }
 0x13c   :  { %v146_v14 = vpop.f32.mrb[0].mxu0 }
 0x13d   :  { %v159_v16 = vsub.f32 %v375_v13, %v146_v14  ;;  %v412_v17 = vpop.f32.mrb[1].mxu0 }
 0x13e   :  { %v149_v19 = vpop.f32.mrb[2].mxu0 }
 0x13f   :  { %v165_v20 = vadd.f32 %v164_v15, %v159_v16  ;;  %v413_v21 = vpop.f32.mrb[3].mxu0 }
 0x141   :  { %v166_v23 = vmax.f32 %v165_v20, 0.0 }
 0x143   :  { %v168_v24 = vand.u32 4294967168, %v166_v23 }
 0x145   :  { %v169_v25 = vor.u32 %v168_v24, %v628_v22 }
 0x147   :  { %v171_v26 = vshra.s32 %v169_v25, 16  ;;  %v170_v28 = vand.u32 65535, %v169_v25 }
 0x149   :  { %v173_v27 = vcvt.s32.f32 %v171_v26  ;;  %v172_v30 = vcvt.s32.f32 %v170_v28 }
 0x14b   :  { %174 = vmin.xlane.f32.xlu0 %v173_v27 }
 0x1d8   :  { %v175_v29 = vpop.xlane.xlu0 %174 }
 0x1d9   :  { %vm176_vm1 = vcmp.eq.f32.partialorder %v173_v27, %v175_v29  ;;  %v181_v32 = vcvt.f32.s32 %v175_v29 }
 0x1da   :  { %v177_v31 = vsel %vm176_vm1, %v172_v30, inf }
 0x1db   :  { %178 = vmin.xlane.f32.xlu1 %v177_v31  ;;  %v182_v34 = vshll.u32 %v181_v32, 16 }
 0x268   :  { %v179_v33 = vpop.xlane.xlu1 %178 }
 0x269   :  { %v180_v35 = vcvt.f32.s32 %v179_v33 }
 0x26b   :  { %v631_v36 = vadd.s32 %v182_v34, %v180_v35 }
 0x26d   :  { %vm187_vm2 = vcmp.eq.s32.totalorder %v169_v25, %v631_v36  ;;  %v185_v45 = vand.u32 4294967168, %v631_v36  ;;  %v184_v30 = vand.u32 127, %v631_v36 }
 0x26e   :  { %v188_v37 = vsel %vm187_vm2, 2147483647, %v169_v25 }
 0x26f   :  { %v190_v38 = vshra.s32 %v188_v37, 16  ;;  %v189_v40 = vand.u32 65535, %v188_v37  ;;  %v244_v49 = vsub.f32 %v185_v45, %v185_v45  ;;  %vm264_vm8 = vcmp.eq.s32.totalorder %v628_v22, %v184_v30 }
 0x271   :  { %v192_v39 = vcvt.s32.f32 %v190_v38  ;;  %v191_v42 = vcvt.s32.f32 %v189_v40  ;;  %v245_v52 = vmul.f32 1.442695, %v244_v49 }
 0x273   :  { %193 = vmin.xlane.f32.xlu1 %v192_v39  ;;  %450 = vpow2.f32 %v245_v52 }
 0x27d   :  { %v451_v58 = vpop.eup %450 }
 0x300   :  { %v194_v41 = vpop.xlane.xlu1 %193 }
 0x301   :  { %vm195_vm3 = vcmp.eq.f32.partialorder %v192_v39, %v194_v41  ;;  %v200_v44 = vcvt.f32.s32 %v194_v41 }
 0x302   :  { %v196_v43 = vsel %vm195_vm3, %v191_v42, inf }
 0x303   :  { %197 = vmin.xlane.f32.xlu0 %v196_v43  ;;  %v201_v47 = vshll.u32 %v200_v44, 16 }
 0x390   :  { %v198_v46 = vpop.xlane.xlu0 %197 }
 0x391   :  { %v199_v48 = vcvt.f32.s32 %v198_v46 }
 0x393   :  { %v635_v50 = vadd.s32 %v201_v47, %v199_v48 }
 0x395   :  { %v204_v51 = vand.u32 4294967168, %v635_v50  ;;  %vm206_vm4 = vcmp.eq.s32.totalorder %v188_v37, %v635_v50  ;;  %v203_v31 = vand.u32 127, %v635_v50 }
 0x396   :  { %v207_v53 = vsel %vm206_vm4, 2147483647, %v188_v37 }
 0x397   :  { %v247_v54 = vsub.f32 %v185_v45, %v204_v51  ;;  %v209_v55 = vshra.s32 %v207_v53, 16  ;;  %v208_v61 = vand.u32 65535, %v207_v53  ;;  %vm266_vm9 = vcmp.eq.s32.totalorder %v628_v22, %v203_v31 }
 0x399   :  { %v248_v56 = vmul.f32 1.442695, %v247_v54  ;;  %v211_v57 = vcvt.s32.f32 %v209_v55  ;;  %v210_v63 = vcvt.s32.f32 %v208_v61 }
 0x39b   :  { %452 = vpow2.f32 %v248_v56  ;;  %212 = vmin.xlane.f32.xlu1 %v211_v57 }
 0x3a5   :  { %v453_v59 = vpop.eup %452 }
 0x3a6   :  { %v256_v60 = vadd.f32 %v453_v59, %v451_v58 }
 0x428   :  { %v213_v62 = vpop.xlane.xlu1 %212 }
 0x429   :  { %vm214_vm5 = vcmp.eq.f32.partialorder %v211_v57, %v213_v62  ;;  %v219_v1 = vcvt.f32.s32 %v213_v62 }
 0x42a   :  { %v215_v0 = vsel %vm214_vm5, %v210_v63, inf }
 0x42b   :  { %216 = vmin.xlane.f32.xlu0 %v215_v0  ;;  %v220_v3 = vshll.u32 %v219_v1, 16 }
 0x4b8   :  { %v217_v2 = vpop.xlane.xlu0 %216 }
 0x4b9   :  { %v218_v5 = vcvt.f32.s32 %v217_v2 }
 0x4bb   :  { %v639_v6 = vadd.s32 %v220_v3, %v218_v5 }
 0x4bd   :  { %v223_v7 = vand.u32 4294967168, %v639_v6  ;;  %vm225_vm6 = vcmp.eq.s32.totalorder %v207_v53, %v639_v6  ;;  %v222_v32 = vand.u32 127, %v639_v6 }
 0x4be   :  { %v226_v8 = vsel %vm225_vm6, 2147483647, %v207_v53 }
 0x4bf   :  { %v250_v9 = vsub.f32 %v185_v45, %v223_v7  ;;  %v228_v10 = vshra.s32 %v226_v8, 16  ;;  %v227_v15 = vand.u32 65535, %v226_v8  ;;  %vm269_vm10 = vcmp.eq.s32.totalorder %v628_v22, %v222_v32 }
 0x4c1   :  { %v251_v11 = vmul.f32 1.442695, %v250_v9  ;;  %v230_v12 = vcvt.s32.f32 %v228_v10  ;;  %v229_v17 = vcvt.s32.f32 %v227_v15 }
 0x4c3   :  { %454 = vpow2.f32 %v251_v11  ;;  %231 = vmin.xlane.f32.xlu1 %v230_v12 }
 0x4cd   :  { %v455_v13 = vpop.eup %454 }
 0x4ce   :  { %v257_v14 = vadd.f32 %v455_v13, %v256_v60 }
 0x550   :  { %v232_v16 = vpop.xlane.xlu1 %231 }
 0x551   :  { %vm233_vm7 = vcmp.eq.f32.partialorder %v230_v12, %v232_v16  ;;  %v238_v19 = vcvt.f32.s32 %v232_v16 }
 0x552   :  { %v234_v18 = vsel %vm233_vm7, %v229_v17, inf }
 0x553   :  { %235 = vmin.xlane.f32.xlu0 %v234_v18  ;;  %v239_v21 = vshll.u32 %v238_v19, 16 }
 0x5e0   :  { %v236_v20 = vpop.xlane.xlu0 %235 }
 0x5e1   :  { %v237_v23 = vcvt.f32.s32 %v236_v20 }
 0x5e3   :  { %v643_v24 = vadd.s32 %v239_v21, %v237_v23 }
 0x5e5   :  { %v242_v25 = vand.u32 4294967168, %v643_v24  ;;  %v241_v39 = vand.u32 127, %v643_v24 }
 0x5e7   :  { %v253_v26 = vsub.f32 %v185_v45, %v242_v25  ;;  %vm272_vm11 = vcmp.eq.s32.totalorder %v628_v22, %v241_v39 }
 0x5e9   :  { %v254_v27 = vmul.f32 1.442695, %v253_v26 }
 0x5eb   :  { %456 = vpow2.f32 %v254_v27 }
 0x5f5   :  { %v457_v28 = vpop.eup %456 }
 0x5f6   :  { %v258_v29 = vadd.f32 %v457_v28, %v257_v14 }
 0x5f8   :  { %458 = vrcp.f32 %v258_v29 }
 0x602   :  { %v459_v33 = vpop.eup %458 }
 0x603   :  { %v260_v34 = vmul.f32 %v459_v33, %v451_v58  ;;  %v261_v35 = vmul.f32 %v459_v33, %v453_v59  ;;  %v262_v37 = vmul.f32 %v459_v33, %v455_v13  ;;  %v263_v38 = vmul.f32 %v459_v33, %v457_v28 }
 0x605   :  { %v265_v40 = vsel %vm264_vm8, %v260_v34, 0.0  ;;  %v267_v41 = vsel %vm266_vm9, %v261_v35, 0.0  ;;  %v270_v36 = vsel %vm269_vm10, %v262_v37, 0.0  ;;  %v273_v44 = vsel %vm272_vm11, %v263_v38, 0.0 }
 0x606   :  { %v268_v42 = vadd.f32 %v267_v41, %v265_v40 }
 0x608   :  { %v271_v43 = vadd.f32 %v270_v36, %v268_v42 }
 0x60a   :  { %v274_v45 = vadd.f32 %v273_v44, %v271_v43 }
 0x60c   :  { %v275_v46 = vpack.c.bf16 %v274_v45, %v274_v45 }
 0x60e   :  { %431 = vmatmul.mubr.bf16.vlgmr.msra.gmra.mrb[0].mxu1 %v275_v46 }
 0x6e1   :  { %v310_v47 = vpop.f32.mrb[0].mxu1 }
 0x6e2   :  { %v317_v48 = vsub.f32 %v310_v47, %v620_v4  ;;  %316 = vst [vmem:[#allocation7] sm:$0xff] %v310_v47  ;;  %v432_v49 = vpop.f32.mrb[1].mxu1 }
 0x6e3   :  { %v313_v50 = vpop.f32.mrb[2].mxu1 }
 0x6e4   :  { %v433_v51 = vpop.f32.mrb[3].mxu1  ;;  %v318_v52 = vmul.f32 %v317_v48, %v317_v48 }
 0x6e6   :  { %319 = vadd.xlane.f32.xlu1 %v318_v52 }
 0x6e7   :  { %515 = shalt.err (!%p512_p6)
}
 0x6e8   :  { %s516_s19 = scalar_lea.hbm %s687_s3, 128 }
 0x6e9   :  { %p517_p7 = scmp.ne.s32.totalorder %s687_s3, %s516_s19  ;;  %p520_p8 = scmp.lt.u32.totalorder %s516_s19, %s687_s3 }
 0x6eb   :  { %p522_p9 = pnand %p520_p8, %p517_p7 }
 0x6ed   :  { %525 = shalt.err (!%p522_p9)
}
 0x6ee   :  { %346 = dma.vmem_to_hbm [thread:$0]  %s344_s15, 128, %s687_s3, [#allocation4]   ;;  %vm322_vm12 = vcmp.eq.s32.totalorder %v628_v22, 4  ;;  %vm324_vm13 = vcmp.eq.s32.totalorder %v628_v22, 0  ;;  %vm327_vm14 = vcmp.eq.s32.totalorder %v628_v22, 1  ;;  %vm330_vm15 = vcmp.eq.s32.totalorder %v628_v22, 2 }
 0x6ef   :  { %v325_v53 = vsel %vm324_vm13, %v184_v30, 0  ;;  %v328_v56 = vsel %vm327_vm14, %v203_v31, 0  ;;  %vm333_vm0 = vcmp.eq.s32.totalorder %v628_v22, 3  ;;  %v331_v58 = vsel %vm330_vm15, %v222_v32, 0  ;;  %s563_s26 = smov [#allocation8]  }
 0x6f0   :  { %s353_s27 = sshll.u32 %s563_s26, 4  ;;  %v334_v60 = vsel %vm333_vm0, %v241_v39, 0  ;;  %s354_s27 = int_to_ptr.vmem [resolvable:$true] %s353_s27 }
 0x6f1   :  { %s526_s3 = scalar_lea.vmem %s354_s27, 128  ;;  %p531_p11 = scmp.lt.s32.totalorder %s354_s27, %s354_s27 }
 0x6f2   :  { %p527_p10 = scmp.ne.s32.totalorder %s354_s27, %s526_s3  ;;  %p532_p12 = scmp.lt.s32.totalorder %s526_s3, %s526_s3 }
 0x6f4   :  { %p533_p13 = por %p532_p12, %p531_p11 }
 0x6f6   :  { %p534_p0 = pnand %p533_p13, %p527_p10 }
 0x773   :  { %v320_v4 = vpop.xlane.xlu1 %319 }
 0x774   :  { %v323_v54 = vsel %vm322_vm12, %v320_v4, 0 }
 0x775   :  { %v326_v55 = vadd.s32 %v325_v53, %v323_v54 }
 0x777   :  { %v329_v57 = vadd.s32 %v328_v56, %v326_v55 }
 0x779   :  { %v332_v59 = vadd.s32 %v331_v58, %v329_v57 }
 0x77b   :  { %v335_v61 = vadd.s32 %v334_v60, %v332_v59 }
 0x77d   :  { %336 = vst [vmem:[#allocation8] sm:$0xff] %v335_v61 }
 0x77e   :  { %537 = shalt.err (!%p534_p0)
}
 0x77f   :  { %s538_s30 = scalar_lea.hbm %s688_s4, 128 }
 0x780   :  { %p539_p1 = scmp.ne.s32.totalorder %s688_s4, %s538_s30  ;;  %p542_p2 = scmp.lt.u32.totalorder %s538_s30, %s688_s4 }
 0x782   :  { %p544_p3 = pnand %p542_p2, %p539_p1 }
 0x784   :  { %547 = shalt.err (!%p544_p3)
}
 0x785   :  { %356 = dma.vmem_to_hbm [thread:$0]  %s354_s27, 128, %s688_s4, [#allocation9]  }
 0x786   :  { %552 = dma.done.wait [#allocation4], 128  }
 0x787   :  { %553 = vsyncadd [#allocation4], 4294967168 }
 0x788   :  { %554 = dma.done.wait [#allocation9], 128  }
 0x789   :  { %555 = vsyncadd [#allocation9], 4294967168 }
 0x78a   :  { %363 = vsyncpa [#allocation3], 1 }
 0x78b   :  { %364 = vsyncpa [#allocation6], 1 }
 0x78c   :  { %365 = vsyncpa [#allocation4], 1 }
 0x78d   :  { %366 = vsyncpa [#allocation9], 1 }

</bundles_post_ra>
